<compile_context>
chip_gen: v5e
topology: v5e:2x2
jax: 0.10.0
libtpu: 0.0.40
codegen_flags: <defaults>
</compile_context>

<pallas_src>
import jax
import jax.numpy as jnp
import numpy as np
from jax.experimental import pallas as pl
from jax.experimental.pallas import tpu as pltpu


def _round_up(v, m):
    return ((v + m - 1) // m) * m


def _mfc_kernel(klim_ref, x_ref, w_ref, b_ref, o_ref, acc_ref):
    """One (tm, tn) output tile, accumulated over the K grid axis."""
    n = pl.program_id(1)
    k = pl.program_id(2)

    @pl.when(k == 0)
    def _init():
        acc_ref[...] = jnp.zeros_like(acc_ref)

    # Skip K tiles that are structurally zero for this output tile
    # (block-triangular autoregressive mask folded into the weight).
    @pl.when(k < klim_ref[n])
    def _accum():
        acc_ref[...] += jnp.dot(
            x_ref[...], w_ref[...], preferred_element_type=jnp.float32
        )

    @pl.when(k == pl.num_programs(2) - 1)
    def _writeback():
        o_ref[...] = (acc_ref[...] + b_ref[...]).astype(o_ref.dtype)


def masked_fc_pallas(x_flat, weight, mask, bias):
    """x_flat: (B, F_in); weight/mask: (F_out, F_in); bias: (F_out,) -> (B, F_out)."""
    B, F_in = x_flat.shape
    F_out, _ = weight.shape

    # ---- tile sizes / padded extents (lane-dense, sublane-aligned) ----
    tm = _round_up(min(B, 256), 8)
    B_pad = _round_up(B, tm)
    tn = min(256, _round_up(F_out, 128))
    F_out_pad = _round_up(F_out, tn)
    tk = min(512, _round_up(F_in, 128))
    F_in_pad = _round_up(F_in, tk)

    num_m = B_pad // tm
    num_n = F_out_pad // tn
    num_k = F_in_pad // tk

    # ---- fold the static mask into the weight once; pre-transpose to (F_in, F_out) ----
    w_t = (weight * mask).T
    w_pad = jnp.pad(w_t, ((0, F_in_pad - F_in), (0, F_out_pad - F_out)))
    x_pad = jnp.pad(x_flat, ((0, B_pad - B), (0, F_in_pad - F_in)))
    b_pad = jnp.pad(bias, (0, F_out_pad - F_out)).reshape(1, F_out_pad)

    # ---- per-N-tile K-extent (in K tiles) from the mask's block-triangular structure ----
    m_t_pad = jnp.pad(mask.T, ((0, F_in_pad - F_in), (0, F_out_pad - F_out)))
    row_ids = jnp.arange(F_in_pad, dtype=jnp.int32)[:, None] + 1
    col_extent = jnp.max(jnp.where(m_t_pad > 0, row_ids, 0), axis=0)      # (F_out_pad,)
    tile_extent = jnp.max(col_extent.reshape(num_n, tn), axis=1)          # (num_n,)
    klim = ((tile_extent + tk - 1) // tk).astype(jnp.int32)               # K tiles needed

    # Clamp K block index for skipped tiles so their DMAs re-use the previous block.
    def _kk(k, n, klim_ref):
        return jnp.minimum(k, jnp.maximum(klim_ref[n] - 1, 0))

    x_spec = pl.BlockSpec((tm, tk), lambda m, n, k, klim: (m, _kk(k, n, klim)))
    w_spec = pl.BlockSpec((tk, tn), lambda m, n, k, klim: (_kk(k, n, klim), n))
    b_spec = pl.BlockSpec((1, tn), lambda m, n, k, klim: (0, n))
    o_spec = pl.BlockSpec((tm, tn), lambda m, n, k, klim: (m, n))

    out_pad = pl.pallas_call(
        _mfc_kernel,
        out_shape=jax.ShapeDtypeStruct((B_pad, F_out_pad), jnp.float32),
        grid_spec=pltpu.PrefetchScalarGridSpec(
            num_scalar_prefetch=1,
            grid=(num_m, num_n, num_k),
            in_specs=[x_spec, w_spec, b_spec],
            out_specs=o_spec,
            scratch_shapes=[pltpu.VMEM((tm, tn), jnp.float32)],
        ),
        compiler_params=pltpu.CompilerParams(
            dimension_semantics=("parallel", "parallel", "arbitrary"),
        ),
    )(klim, x_pad, w_pad, b_pad)

    return out_pad[:B, :F_out]


def build_mask(mask_type, in_channels, out_channels, in_features, out_features):
    """Reproduce the autoregressive mask construction from __init__."""
    assert mask_type in ("A", "B")
    mask = np.zeros((out_features, in_features), dtype=np.float32)
    start_f = 0 if mask_type == "B" else 1
    for f_idx in range(start_f, out_features // out_channels):
        start_row = f_idx * out_channels
        end_row = (f_idx + 1) * out_channels
        start_col = 0
        end_col = (
            f_idx * in_channels if mask_type == "A" else (f_idx + 1) * in_channels
        )
        if start_col != end_col:
            mask[start_row:end_row, start_col:end_col] = 1.0
    return jnp.asarray(mask)


def masked_fully_connection_forward(x, weight, mask, bias, out_channels):
    """Full forward matching the PyTorch module.

    x: (B, in_channels, L)  -> returns (B, out_channels, L_out)
    """
    B = x.shape[0]
    # transpose(1,2).contiguous().view(B, -1)   (layout plumbing, wrapper-side)
    x_flat = jnp.transpose(x, (0, 2, 1)).reshape(B, -1)
    o_flat = masked_fc_pallas(x_flat, weight, mask, bias)
    # view(B, -1, out_channels).transpose(1,2)
    o = o_flat.reshape(B, -1, out_channels)
    o = jnp.transpose(o, (0, 2, 1))
    return o


if __name__ == "__main__":
    # Small, deterministic config consistent with the module:
    #   code length L = 8, in_channels = 4, out_channels = 4
    #   in_features  = L * in_channels  = 32
    #   out_features = L * out_channels = 32
    mask_type = "A"
    in_channels, out_channels = 4, 4
    L = 8
    in_features = L * in_channels
    out_features = L * out_channels
    B = 2

    key = jax.random.PRNGKey(0)
    kx, kw, kb = jax.random.split(key, 3)

    # Deterministic parameter init (synthetic; shapes match nn.Linear).
    bound = 1.0 / np.sqrt(in_features)
    weight = jax.random.uniform(
        kw, (out_features, in_features), jnp.float32, -bound, bound
    )
    bias = jax.random.uniform(kb, (out_features,), jnp.float32, -bound, bound)
    mask = build_mask(mask_type, in_channels, out_channels, in_features, out_features)

    x = jax.random.normal(kx, (B, in_channels, L), jnp.float32)

    out = masked_fully_connection_forward(x, weight, mask, bias, out_channels)
    out = jax.block_until_ready(out)

    # Pure-JAX reference check.
    x_flat = jnp.transpose(x, (0, 2, 1)).reshape(B, -1)
    ref = x_flat @ (weight * mask).T + bias
    ref = jnp.transpose(ref.reshape(B, -1, out_channels), (0, 2, 1))
    assert out.shape == (B, out_channels, L)
    np.testing.assert_allclose(np.asarray(out), np.asarray(ref), rtol=1e-5, atol=1e-5)

    print("KERNEL_OK")
</pallas_src>

<mosaic_0001>
module attributes {stable_mosaic.version = 11 : i64} {
  func.func @_mfc_kernel(%arg0: i32, %arg1: i32, %arg2: i32, %arg3: memref<1xi32, #tpu.memory_space<smem>>, %arg4: memref<8x128xf32, #tpu.memory_space<vmem>>, %arg5: memref<128x128xf32, #tpu.memory_space<vmem>>, %arg6: memref<1x128xf32, #tpu.memory_space<vmem>>, %arg7: memref<8x128xf32, #tpu.memory_space<vmem>>, %arg8: memref<8x128xf32, #tpu.memory_space<vmem>>) attributes {dimension_semantics = [#tpu.dimension_semantics<parallel>, #tpu.dimension_semantics<parallel>, #tpu.dimension_semantics<arbitrary>], iteration_bounds = array<i64: 1, 1, 1>, scalar_prefetch = 1 : i64, scratch_operands = 1 : i64, tpu.core_type = #tpu.core_type<tc>, window_params = [{transform_indices = @transform_0, window_bounds = array<i64: 8, 128>}, {transform_indices = @transform_1, window_bounds = array<i64: 128, 128>}, {transform_indices = @transform_2, window_bounds = array<i64: 1, 128>}, {transform_indices = @transform_3, window_bounds = array<i64: 8, 128>}]} {
    %c0_i32 = arith.constant 0 : i32
    %0 = arith.cmpi eq, %arg2, %c0_i32 : i32
    %1 = arith.extui %0 : i1 to i32
    %c0_i32_0 = arith.constant 0 : i32
    %2 = arith.cmpi ne, %1, %c0_i32_0 : i32
    scf.if %2 {
      %cst = arith.constant 0.000000e+00 : f32
      %11 = vector.broadcast %cst : f32 to vector<8x128xf32>
      %c0 = arith.constant 0 : index
      %c0_4 = arith.constant 0 : index
      %12 = vector.load %arg8[%c0, %c0_4] : memref<8x128xf32, #tpu.memory_space<vmem>>, vector<8x128xf32>
      tpu.vector_store %arg8[%c0, %c0_4], %11 {strides = array<i32>} : memref<8x128xf32, #tpu.memory_space<vmem>>, vector<8x128xf32>,
    } else {
    }
    %3 = arith.index_cast %arg1 : i32 to index
    %4 = memref.load %arg3[%3] : memref<1xi32, #tpu.memory_space<smem>>
    %5 = arith.cmpi slt, %arg2, %4 : i32
    %6 = arith.extui %5 : i1 to i32
    %c0_i32_1 = arith.constant 0 : i32
    %7 = arith.cmpi ne, %6, %c0_i32_1 : i32
    scf.if %7 {
      %c0 = arith.constant 0 : index
      %c0_4 = arith.constant 0 : index
      %11 = vector.load %arg8[%c0, %c0_4] : memref<8x128xf32, #tpu.memory_space<vmem>>, vector<8x128xf32>
      %c0_5 = arith.constant 0 : index
      %c0_6 = arith.constant 0 : index
      %12 = vector.load %arg4[%c0_5, %c0_6] : memref<8x128xf32, #tpu.memory_space<vmem>>, vector<8x128xf32>
      %c0_7 = arith.constant 0 : index
      %c0_8 = arith.constant 0 : index
      %13 = vector.load %arg5[%c0_7, %c0_8] : memref<128x128xf32, #tpu.memory_space<vmem>>, vector<128x128xf32>
      %cst = arith.constant dense<0.000000e+00> : vector<8x128xf32>
      %14 = tpu.matmul %12, %13, %cst {dimension_numbers = #tpu.dot_dimension_numbers<[1], [0], [0], [1], [0, 0, 1, 1], [], []>} : vector<8x128xf32>, vector<128x128xf32>, vector<8x128xf32> -> vector<8x128xf32>
      %15 = arith.addf %11, %14 : vector<8x128xf32>
      %c0_9 = arith.constant 0 : index
      %c0_10 = arith.constant 0 : index
      %16 = vector.load %arg8[%c0_9, %c0_10] : memref<8x128xf32, #tpu.memory_space<vmem>>, vector<8x128xf32>
      tpu.vector_store %arg8[%c0_9, %c0_10], %15 {strides = array<i32>} : memref<8x128xf32, #tpu.memory_space<vmem>>, vector<8x128xf32>,
    } else {
    }
    %c0_i32_2 = arith.constant 0 : i32
    %8 = arith.cmpi eq, %arg2, %c0_i32_2 : i32
    %9 = arith.extui %8 : i1 to i32
    %c0_i32_3 = arith.constant 0 : i32
    %10 = arith.cmpi ne, %9, %c0_i32_3 : i32
    scf.if %10 {
      %c0 = arith.constant 0 : index
      %c0_4 = arith.constant 0 : index
      %11 = vector.load %arg8[%c0, %c0_4] : memref<8x128xf32, #tpu.memory_space<vmem>>, vector<8x128xf32>
      %c0_5 = arith.constant 0 : index
      %c0_6 = arith.constant 0 : index
      %12 = vector.load %arg6[%c0_5, %c0_6] : memref<1x128xf32, #tpu.memory_space<vmem>>, vector<1x128xf32>
      %13 = vector.broadcast %12 : vector<1x128xf32> to vector<8x128xf32>
      %14 = arith.addf %11, %13 : vector<8x128xf32>
      %c0_7 = arith.constant 0 : index
      %c0_8 = arith.constant 0 : index
      %15 = vector.load %arg7[%c0_7, %c0_8] : memref<8x128xf32, #tpu.memory_space<vmem>>, vector<8x128xf32>
      tpu.vector_store %arg7[%c0_7, %c0_8], %14 {strides = array<i32>} : memref<8x128xf32, #tpu.memory_space<vmem>>, vector<8x128xf32>,
    } else {
    }
    return
  }
  func.func @transform_0(%arg0: i32, %arg1: i32, %arg2: i32, %arg3: memref<1xi32, #tpu.memory_space<smem>>) -> (i32, i32) {
    %0 = arith.index_cast %arg1 : i32 to index
    %1 = memref.load %arg3[%0] : memref<1xi32, #tpu.memory_space<smem>>
    %c1_i32 = arith.constant 1 : i32
    %2 = arith.subi %1, %c1_i32 : i32
    %c0_i32 = arith.constant 0 : i32
    %3 = arith.maxsi %2, %c0_i32 : i32
    %4 = arith.minsi %arg2, %3 : i32
    %c0_i32_0 = arith.constant 0 : i32
    return %arg0, %4 : i32, i32
  }
  func.func @transform_1(%arg0: i32, %arg1: i32, %arg2: i32, %arg3: memref<1xi32, #tpu.memory_space<smem>>) -> (i32, i32) {
    %0 = arith.index_cast %arg1 : i32 to index
    %1 = memref.load %arg3[%0] : memref<1xi32, #tpu.memory_space<smem>>
    %c1_i32 = arith.constant 1 : i32
    %2 = arith.subi %1, %c1_i32 : i32
    %c0_i32 = arith.constant 0 : i32
    %3 = arith.maxsi %2, %c0_i32 : i32
    %4 = arith.minsi %arg2, %3 : i32
    %c0_i32_0 = arith.constant 0 : i32
    return %4, %arg1 : i32, i32
  }
  func.func @transform_2(%arg0: i32, %arg1: i32, %arg2: i32, %arg3: memref<1xi32, #tpu.memory_space<smem>>) -> (i32, i32) {
    %c0_i32 = arith.constant 0 : i32
    %c0_i32_0 = arith.constant 0 : i32
    return %c0_i32, %arg1 : i32, i32
  }
  func.func @transform_3(%arg0: i32, %arg1: i32, %arg2: i32, %arg3: memref<1xi32, #tpu.memory_space<smem>>) -> (i32, i32) {
    %c0_i32 = arith.constant 0 : i32
    return %arg0, %arg1 : i32, i32
  }
}

</mosaic_0001>

<bundles_post_ra>
// kernel: tpu_custom_call.1
= control target key start
LH: loop header
LB: loop body
LE: loop exit
PB: predicated region body
PF: predicated region fallthrough
CT: control target
= control target key end

     0   :  { %10 = vsyncpa [#allocation6], 0  ;;  %s326_s0 = inlined_call_operand.<no memory space> [shape: s32[1], index: 0, kind: input, shape index: {}]   ;;  %s327_s1 = inlined_call_operand.hbm [shape: f32[8,128], index: 1, kind: input, shape index: {}]   ;;  %s328_s2 = inlined_call_operand.hbm [shape: f32[128,128], index: 2, kind: input, shape index: {}]   ;;  %s329_s3 = inlined_call_operand.vmem [shape: f32[1,128], index: 3, kind: input, shape index: {}]   ;;  %s330_s4 = inlined_call_operand.hbm [shape: f32[8,128], index: 4, kind: output, shape index: {}]  }
   0x1   :  { %11 = vsyncpa [#allocation9], 0 }
   0x2   :  { %12 = vsyncpa [#allocation7], 0  ;;  %s159_s17 = sadd.s32 4294967295, %s326_s0  ;;  %s260_s18 = smov [#allocation5]  }
   0x3   :  { %p17_p0 = scmp.gt.s32.totalorder %s159_s17, 0  ;;  %s28_s19 = sshll.u32 %s260_s18, 4  ;;  %s29_s19 = int_to_ptr.vmem [resolvable:$true] %s28_s19 }
   0x4   :  { %s261_s20 = smov [#allocation8]   ;;  %s186_s10 = scalar_lea.hbm %s327_s1, 8 }
   0x5   :  { %s332_s17 = smov (!%p17_p0, %s159_s17), 0  ;;  %s294_s21 = sshll.u32 %s261_s20, 4  ;;  %s48_s21 = int_to_ptr.vmem [resolvable:$true] %s294_s21 }
   0x6   :  { %s334_s17 = smov (%p17_p0, %s332_s17), 0 }
   0x7   :  { %s161_s22 = sshll.u32 %s334_s17, 3  ;;  %s174_s23 = sshll.u32 %s334_s17, 7 }
   0x8   :  { %s24_s26 = scalar_lea.hbm %s327_s1, %s161_s22  ;;  %s44_s29 = scalar_lea.hbm %s328_s2, %s174_s23 }
   0x9   :  { %s26_s30 = sshll.u32 %s24_s26, 4  ;;  %s45_s5 = sshll.u32 %s44_s29, 4  ;;  %s27_s30 = int_to_ptr.hbm [resolvable:$true] %s26_s30  ;;  %s46_s5 = int_to_ptr.hbm [resolvable:$true] %s45_s5 }
   0xa   :  { %s182_s6 = sshra.s32 %s27_s30, 4  ;;  %s183_s6 = int_to_ptr.hbm [resolvable:$true] %s182_s6 }
   0xb   :  { %s184_s7 = scalar_lea.hbm %s183_s6, 8  ;;  %p187_p2 = scmp.lt.s32.totalorder %s183_s6, %s327_s1 }
   0xc   :  { %p185_p1 = scmp.ne.s32.totalorder %s183_s6, %s184_s7  ;;  %p188_p3 = scmp.lt.s32.totalorder %s186_s10, %s184_s7 }
   0xe   :  { %p189_p4 = por %p188_p3, %p187_p2 }
  0x10   :  { %p190_p5 = pnand %p189_p4, %p185_p1 }
  0x12   :  { %193 = shalt.err (!%p190_p5)
}
  0x13   :  { %31 = dma.hbm_to_vmem [thread:$0]  %s27_s30, 128, %s29_s19, [#allocation6]  }
  0x14   :  { %s206_s13 = sshra.s32 %s46_s5, 4  ;;  %s210_s17 = scalar_lea.hbm %s328_s2, 128  ;;  %s207_s13 = int_to_ptr.hbm [resolvable:$true] %s206_s13 }
  0x15   :  { %s208_s14 = scalar_lea.hbm %s207_s13, 128  ;;  %p211_p7 = scmp.lt.s32.totalorder %s207_s13, %s328_s2 }
  0x16   :  { %p209_p6 = scmp.ne.s32.totalorder %s207_s13, %s208_s14  ;;  %p212_p8 = scmp.lt.s32.totalorder %s210_s17, %s208_s14 }
  0x18   :  { %p213_p9 = por %p212_p8, %p211_p7 }
  0x1a   :  { %p214_p10 = pnand %p213_p9, %p209_p6 }
  0x1c   :  { %217 = shalt.err (!%p214_p10)
}
  0x1d   :  { %s262_s1 = smov 128   ;;  %s263_s22 = smov 8  }
  0x1e   :  { %53 = dma.hbm_to_vmem [thread:$0]  %s46_s5, 2048, %s48_s21, [#allocation9], %s262_s1, %s262_s1, %s263_s22  }
  0x1f   :  { %254 = dma.done.wait [#allocation6], 128  }
  0x20   :  { %255 = vsyncadd [#allocation6], 4294967168 }
  0x21   :  { %256 = dma.done.wait [#allocation9], 2048  }
  0x22   :  { %257 = vsyncadd [#allocation9], 4294965248  ;;  %v264_v0 = vmov 0.0   ;;  %p167_p11 = scmp.le.s32.totalorder %s326_s0, 0 }
  0x23   :  { %81 = vst [vmem:[#allocation2] sm:$0xff] %v264_v0 }
  0x24   :  { %86 = sbr.rel (%p167_p11) target bundleno = 202 (0xca), region = 29 }
  0x29   :  { %v104_v1 = vld [vmem:[#allocation8 + $0x78] sm:$0xff]  ;;  %v103_v2 = vld [vmem:[#allocation8 + $0x70] sm:$0xff]  ;;  %v102_v3 = vld [vmem:[#allocation8 + $0x68] sm:$0xff] }
  0x2a   :  { %105 = vmatpush.msra.mxu0 %v104_v1  ;;  %v101_v4 = vld [vmem:[#allocation8 + $0x60] sm:$0xff]  ;;  %v100_v5 = vld [vmem:[#allocation8 + $0x58] sm:$0xff]  ;;  %v99_v6 = vld [vmem:[#allocation8 + $0x50] sm:$0xff] }
  0x2b   :  { %v98_v7 = vld [vmem:[#allocation8 + $0x48] sm:$0xff]  ;;  %v97_v8 = vld [vmem:[#allocation8 + $0x40] sm:$0xff]  ;;  %v96_v9 = vld [vmem:[#allocation8 + $0x38] sm:$0xff] }
  0x2c   :  { %106 = vmatpush.msra.mxu0 %v103_v2  ;;  %v95_v10 = vld [vmem:[#allocation8 + $0x30] sm:$0xff]  ;;  %v94_v11 = vld [vmem:[#allocation8 + $0x28] sm:$0xff]  ;;  %v93_v12 = vld [vmem:[#allocation8 + $0x20] sm:$0xff] }
  0x2d   :  { %v92_v13 = vld [vmem:[#allocation8 + $0x18] sm:$0xff]  ;;  %v91_v14 = vld [vmem:[#allocation8 + $0x10] sm:$0xff]  ;;  %v90_v15 = vld [vmem:[#allocation8 + $0x8] sm:$0xff] }
  0x2e   :  { %107 = vmatpush.msra.mxu0 %v102_v3  ;;  %v89_v16 = vld [vmem:[#allocation8] sm:$0xff]  ;;  %v88_v17 = vld [vmem:[#allocation5] sm:$0xff]  ;;  %v87_v18 = vld [vmem:[#allocation2] sm:$0xff] }
  0x30   :  { %108 = vmatpush.msra.mxu0 %v101_v4 }
  0x32   :  { %109 = vmatpush.msra.mxu0 %v100_v5 }
  0x34   :  { %110 = vmatpush.msra.mxu0 %v99_v6 }
  0x36   :  { %111 = vmatpush.msra.mxu0 %v98_v7 }
  0x38   :  { %112 = vmatpush.msra.mxu0 %v97_v8 }
  0x3a   :  { %113 = vmatpush.msra.mxu0 %v96_v9 }
  0x3c   :  { %114 = vmatpush.msra.mxu0 %v95_v10 }
  0x3e   :  { %115 = vmatpush.msra.mxu0 %v94_v11 }
  0x40   :  { %116 = vmatpush.msra.mxu0 %v93_v12 }
  0x42   :  { %117 = vmatpush.msra.mxu0 %v92_v13 }
  0x44   :  { %118 = vmatpush.msra.mxu0 %v91_v14 }
  0x46   :  { %119 = vmatpush.msra.mxu0 %v90_v15 }
  0x48   :  { %120 = vmatpush.msra.mxu0 %v89_v16 }
  0x49   :  { %121 = vmatmul.f32.vlgmr.msra.gmra.mxu0 %v88_v17 }
  0xc6   :  { %v122_v19 = vpop.f32.mrf.mxu0 }
  0xc7   :  { %v125_v20 = vadd.f32 %v122_v19, %v87_v18 }
  0xc9   :  { %126 = vst [vmem:[#allocation2] sm:$0xff] %v125_v20 }
  0xca PF:  { %v181_v22 = vld [vmem:[%s329_s3] ss:$0 sm:$0xff]  ;;  %s265_s21 = smov [#allocation10]   ;;  %s144_s27 = sshll.u32 %s330_s4, 4  ;;  %s145_s27 = int_to_ptr.hbm [resolvable:$true] %s144_s27 }
  0xcb   :  { %s142_s24 = sshll.u32 %s265_s21, 4  ;;  %s143_s24 = int_to_ptr.vmem [resolvable:$true] %s142_s24 }
  0xd0   :  { %v130_v21 = vld [vmem:[#allocation2] sm:$0xff] }
  0xd1   :  { %v135_v23 = vadd.f32 %v181_v22, %v130_v21 }
  0xd3   :  { %136 = vst [vmem:[#allocation10] sm:$0xff] %v135_v23 }
  0xd4   :  { %147 = dma.vmem_to_hbm [thread:$0]  %s143_s24, 128, %s145_s27, [#allocation7]  }
  0xd5   :  { %258 = dma.done.wait [#allocation7], 128  }
  0xd6   :  { %259 = vsyncadd [#allocation7], 4294967168 }
  0xd7   :  { %152 = vsyncpa [#allocation6], 1 }
  0xd8   :  { %153 = vsyncpa [#allocation9], 1 }
  0xd9   :  { %154 = vsyncpa [#allocation7], 1 }

</bundles_post_ra>
